<compile_context>
chip_gen: v5e
topology: v5e:2x2
jax: 0.10.0
libtpu: 0.0.40
codegen_flags: <defaults>
</compile_context>

<pallas_src>
import functools

import numpy as np
import jax
import jax.numpy as jnp
from jax.experimental import pallas as pl
from jax.experimental.pallas import tpu as pltpu


def _round_up(n: int, m: int) -> int:
    return ((n + m - 1) // m) * m


def _cdiv(a: int, b: int) -> int:
    return (a + b - 1) // b


def _vmem_budget_bytes() -> int:
    """Chip-aware scoped-VMEM budget (v7x has only 64 MiB/TC)."""
    cap = None
    try:
        info = pltpu.get_tpu_info()
        cap = getattr(info, "vmem_capacity_bytes", None)
    except Exception:
        cap = None
    if cap is None:
        cap = 128 << 20
    if cap <= (64 << 20):        # v7x-class TensorCore
        return 24 << 20
    return 48 << 20              # v5e / v6e (128 MiB physical)


# ----------------------------------------------------------------------------------
# Pallas kernel
# ----------------------------------------------------------------------------------
def _msg_recovery_kernel(*refs, B, Lm, Lc, tb, spc, lm_pad, lc_pad,
                         use_ldpc, mean_reduce,
                         need_row_mask, need_lane_mask_msg, need_lane_mask_ldpc):
    if use_ldpc:
        dec_ref, tgt_ref, ldpc_ref, out_ref, acc_bce, acc_ldpc = refs
    else:
        dec_ref, tgt_ref, out_ref, acc_bce = refs
        ldpc_ref = None
        acc_ldpc = None

    c = pl.program_id(0)             # core / batch-half axis ("parallel")
    s = pl.program_id(1)             # row-tile axis ("arbitrary", carries acc)

    # ---- init per-core accumulators on the first row-tile ----
    @pl.when(s == 0)
    def _init():
        acc_bce[...] = jnp.zeros_like(acc_bce)
        if use_ldpc:
            acc_ldpc[...] = jnp.zeros_like(acc_ldpc)

    # ---- load this row-tile (native dtype on the wire, f32 in-kernel) ----
    x = dec_ref[...].astype(jnp.float32)       # (tb, lm_pad)
    t = tgt_ref[...].astype(jnp.float32)       # (tb, lm_pad)

    # Stable BCE-with-logits; z = exp(-|x|) is reused for the sigmoid below.
    z = jnp.exp(-jnp.abs(x))
    bce = jnp.maximum(x, 0.0) - x * t + jnp.log1p(z)

    # ---- masks (built only when statically needed; edge blocks of the unpadded
    #      HBM arrays may contain garbage — the selects remove it) ----
    row_mask = None
    if need_row_mask:
        i = c * spc + s                        # logical (unclamped) row-tile index
        rows = i * tb + jax.lax.broadcasted_iota(jnp.int32, (tb, 1), 0)
        row_mask = rows < B
    lane_mask_msg = None
    if need_lane_mask_msg:
        lane_mask_msg = jax.lax.broadcasted_iota(jnp.int32, (1, lm_pad), 1) < Lm

    def _mask(v, rmask, lmask):
        if rmask is not None and lmask is not None:
            return jnp.where(jnp.logical_and(rmask, lmask), v, 0.0)
        if rmask is not None:
            return jnp.where(rmask, v, 0.0)
        if lmask is not None:
            return jnp.where(lmask, v, 0.0)
        return v

    # Loop-carried dep is just this (1, lm_pad) VPU add; the sublane reduce is
    # per-step but not carried.
    acc_bce[...] += jnp.sum(_mask(bce, row_mask, lane_mask_msg),
                            axis=0, keepdims=True)

    if use_ldpc:
        e = ldpc_ref[...].astype(jnp.float32)  # (tb, lc_pad)
        xs = x[:, :lc_pad]                     # lane-aligned static slice (Lc <= Lm)
        zs = z[:, :lc_pad]
        # sigmoid(x) = where(x>=0, 1, z) / (1+z) — reuses z, no second exp.
        sig = jnp.where(xs >= 0.0, 1.0, zs) / (1.0 + zs)
        d = sig - e
        lane_mask_ldpc = None
        if need_lane_mask_ldpc:
            lane_mask_ldpc = jax.lax.broadcasted_iota(jnp.int32, (1, lc_pad), 1) < Lc
        acc_ldpc[...] += jnp.sum(_mask(d * d, row_mask, lane_mask_ldpc),
                                 axis=0, keepdims=True)

    # ---- finalize this core's contribution on its last row-tile ----
    @pl.when(s == pl.num_programs(1) - 1)
    def _finalize():
        bce_sum = jnp.sum(acc_bce[...])
        if mean_reduce:
            contrib = bce_sum * jnp.float32(1.0 / (B * Lm))
        else:
            contrib = bce_sum
        if use_ldpc:
            ldpc_sum = jnp.sum(acc_ldpc[...])
            if mean_reduce:
                contrib = contrib + jnp.float32(0.5 / (B * Lc)) * ldpc_sum
            else:
                contrib = contrib + jnp.float32(0.5) * ldpc_sum
        out_ref[...] = jnp.broadcast_to(contrib, out_ref.shape).astype(jnp.float32)


# ----------------------------------------------------------------------------------
# Wrapper: tiling over the unpadded inputs, dual-core split, pallas_call
# ----------------------------------------------------------------------------------
def message_recovery_loss(decoded, target, ldpc_encoded=None, *,
                          reduction="mean", ldpc_aware=True, block_rows=None):
    if reduction not in ("mean", "sum"):
        # TODO(synk): reduction='none' (per-element output) is not fused here.
        raise NotImplementedError("only 'mean' and 'sum' reductions are fused")

    B, Lm = decoded.shape
    assert target.shape == decoded.shape
    use_ldpc = bool(ldpc_aware) and (ldpc_encoded is not None)
    Lc = int(ldpc_encoded.shape[1]) if use_ldpc else 0
    if use_ldpc:
        assert Lc <= Lm, "LDPC codeword length must not exceed decoded length"
        assert ldpc_encoded.shape[0] == B

    # Lane-dense block widths (vreg lane = 128). No HBM padding is performed.
    lm_pad = _round_up(Lm, 128)
    lc_pad = _round_up(Lc, 128) if use_ldpc else 0

    # Wire bytes per row from the actual input dtypes (bf16 stays bf16 on the wire).
    bytes_per_row = lm_pad * (decoded.dtype.itemsize + target.dtype.itemsize)
    if use_ldpc:
        bytes_per_row += lc_pad * ldpc_encoded.dtype.itemsize

    vmem_budget = _vmem_budget_bytes()
    target_block_bytes = min(6 << 20, vmem_budget // 4)
    tb = max(8, (target_block_bytes // max(bytes_per_row, 1)) // 8 * 8)
    if block_rows is not None:
        tb = max(8, _round_up(int(block_rows), 8))
    tb = int(min(tb, _round_up(B, 8)))

    nt = _cdiv(B, tb)            # row tiles over the (unpadded) batch
    nc = 1 if nt == 1 else 2     # leading "parallel" axis: 2 TensorCores on v7x
    spc = _cdiv(nt, nc)          # row tiles per core (at most one wasted tile)
    last_block = nt - 1

    need_row_mask = (B % tb != 0) or (nc * spc != nt)
    need_lane_mask_msg = (lm_pad != Lm)
    need_lane_mask_ldpc = use_ldpc and (lc_pad != Lc)

    def _row_map(c, s):
        # Clamp so overflow steps re-read the last valid tile (no OOB DMA);
        # the in-kernel row mask (built from the *unclamped* index) zeroes them.
        return (jnp.minimum(c * spc + s, last_block), 0)

    inputs = [decoded, target]
    in_specs = [pl.BlockSpec((tb, lm_pad), _row_map),
                pl.BlockSpec((tb, lm_pad), _row_map)]
    scratch_shapes = [pltpu.VMEM((1, lm_pad), jnp.float32)]
    if use_ldpc:
        inputs.append(ldpc_encoded)
        in_specs.append(pl.BlockSpec((tb, lc_pad), _row_map))
        scratch_shapes.append(pltpu.VMEM((1, lc_pad), jnp.float32))

    # Per-core partial contributions (lane-dense (8,128) slab per core).
    out_shape = jax.ShapeDtypeStruct((nc, 8, 128), jnp.float32)
    out_specs = pl.BlockSpec((1, 8, 128), lambda c, s: (c, 0, 0))

    # Scoped VMEM from the real footprint (2x double-buffered inputs + acc + out + slack).
    block_bytes = tb * bytes_per_row
    acc_bytes = 4 * 8 * (lm_pad + lc_pad)
    needed = 2 * block_bytes + acc_bytes + nc * 8 * 128 * 4 + (2 << 20)
    vmem_limit = int(min(vmem_budget, max(needed, 8 << 20)))

    flops = 7 * B * Lm + (6 * B * Lc if use_ldpc else 0)
    transcendentals = 2 * B * Lm + (B * Lc if use_ldpc else 0)
    bytes_accessed = sum(int(a.size) * a.dtype.itemsize for a in inputs) + nc * 8 * 128 * 4
    cost = pl.CostEstimate(flops=flops, transcendentals=transcendentals,
                           bytes_accessed=bytes_accessed)

    kernel = functools.partial(
        _msg_recovery_kernel,
        B=B, Lm=Lm, Lc=Lc, tb=tb, spc=spc, lm_pad=lm_pad, lc_pad=lc_pad,
        use_ldpc=use_ldpc, mean_reduce=(reduction == "mean"),
        need_row_mask=need_row_mask,
        need_lane_mask_msg=need_lane_mask_msg,
        need_lane_mask_ldpc=need_lane_mask_ldpc)

    partials = pl.pallas_call(
        kernel,
        grid=(nc, spc),
        out_shape=out_shape,
        in_specs=in_specs,
        out_specs=out_specs,
        scratch_shapes=scratch_shapes,
        compiler_params=pltpu.CompilerParams(
            dimension_semantics=("parallel", "arbitrary"),
            vmem_limit_bytes=vmem_limit),
        cost_estimate=cost,
    )(*inputs)

    # Tiny epilogue: combine the per-core partial contributions.
    return jnp.sum(partials[:, 0, 0])


# ----------------------------------------------------------------------------------
# Pure-JAX reference (mirrors the PyTorch math)
# ----------------------------------------------------------------------------------
def _reference(decoded, target, ldpc_encoded=None, *, reduction="mean", ldpc_aware=True):
    red = jnp.mean if reduction == "mean" else jnp.sum
    d = decoded.astype(jnp.float32)
    t = target.astype(jnp.float32)
    bce = red(jnp.maximum(d, 0.0) - d * t + jnp.log1p(jnp.exp(-jnp.abs(d))))
    if ldpc_aware and ldpc_encoded is not None:
        L = ldpc_encoded.shape[1]
        e = ldpc_encoded.astype(jnp.float32)
        return bce + 0.5 * red((jax.nn.sigmoid(d[:, :L]) - e) ** 2)
    return bce


if __name__ == "__main__":
    key = jax.random.PRNGKey(0)
    ks = jax.random.split(key, 6)

    # --- case 1: small shapes consistent with the module (B=2, msg len 64, ldpc len 32)
    B, Lm, Lc = 2, 64, 32
    decoded = jax.random.normal(ks[0], (B, Lm), jnp.float32)
    target = (jax.random.uniform(ks[1], (B, Lm)) > 0.5).astype(jnp.float32)
    ldpc_enc = (jax.random.uniform(ks[2], (B, Lc)) > 0.5).astype(jnp.float32)

    out1 = jax.block_until_ready(message_recovery_loss(decoded, target, ldpc_enc))
    ref1 = _reference(decoded, target, ldpc_enc)
    np.testing.assert_allclose(np.asarray(out1), np.asarray(ref1), rtol=1e-5, atol=1e-5)

    # --- case 2: non-aligned shapes + forced multi-tile grid (masks, accumulation,
    #     dual "parallel" core axis with one clamped overflow tile)
    B2, Lm2, Lc2 = 37, 200, 96
    decoded2 = jax.random.normal(ks[3], (B2, Lm2), jnp.float32)
    target2 = (jax.random.uniform(ks[4], (B2, Lm2)) > 0.5).astype(jnp.float32)
    ldpc_enc2 = (jax.random.uniform(ks[5], (B2, Lc2)) > 0.5).astype(jnp.float32)

    out2 = jax.block_until_ready(
        message_recovery_loss(decoded2, target2, ldpc_enc2, block_rows=8))
    ref2 = _reference(decoded2, target2, ldpc_enc2)
    np.testing.assert_allclose(np.asarray(out2), np.asarray(ref2), rtol=1e-5, atol=1e-5)

    # --- case 2b: sum reduction
    out2s = jax.block_until_ready(
        message_recovery_loss(decoded2, target2, ldpc_enc2, reduction="sum", block_rows=8))
    ref2s = _reference(decoded2, target2, ldpc_enc2, reduction="sum")
    np.testing.assert_allclose(np.asarray(out2s), np.asarray(ref2s), rtol=1e-5, atol=1e-2)

    # --- case 3: BCE-only path (ldpc_encoded=None)
    out3 = jax.block_until_ready(message_recovery_loss(decoded, target, None))
    ref3 = _reference(decoded, target, None)
    np.testing.assert_allclose(np.asarray(out3), np.asarray(ref3), rtol=1e-5, atol=1e-5)

    # --- case 4: bf16 inputs DMA'd natively, upcast in-kernel
    out4 = jax.block_until_ready(
        message_recovery_loss(decoded.astype(jnp.bfloat16),
                              target.astype(jnp.bfloat16),
                              ldpc_enc.astype(jnp.bfloat16)))
    ref4 = _reference(decoded.astype(jnp.bfloat16),
                      target.astype(jnp.bfloat16),
                      ldpc_enc.astype(jnp.bfloat16))
    np.testing.assert_allclose(np.asarray(out4), np.asarray(ref4), rtol=2e-2, atol=2e-2)

    print("KERNEL_OK")
</pallas_src>

<mosaic_0001>
module attributes {stable_mosaic.version = 11 : i64} {
  func.func @_msg_recovery_kernel(%arg0: i32, %arg1: i32, %arg2: memref<8x128xf32, #tpu.memory_space<vmem>>, %arg3: memref<8x128xf32, #tpu.memory_space<vmem>>, %arg4: memref<8x128xf32, #tpu.memory_space<vmem>>, %arg5: memref<1x8x128xf32, #tpu.memory_space<vmem>>, %arg6: memref<1x128xf32, #tpu.memory_space<vmem>>, %arg7: memref<1x128xf32, #tpu.memory_space<vmem>>) attributes {dimension_semantics = [#tpu.dimension_semantics<parallel>, #tpu.dimension_semantics<arbitrary>], iteration_bounds = array<i64: 1, 1>, scalar_prefetch = 0 : i64, scratch_operands = 2 : i64, tpu.core_type = #tpu.core_type<tc>, window_params = [{transform_indices = @transform_0, window_bounds = array<i64: 8, 128>}, {transform_indices = @transform_1, window_bounds = array<i64: 8, 128>}, {transform_indices = @transform_2, window_bounds = array<i64: 8, 128>}, {transform_indices = @transform_3, window_bounds = array<i64: 1, 8, 128>}]} {
    %c0_i32 = arith.constant 0 : i32
    %0 = arith.cmpi eq, %arg1, %c0_i32 : i32
    %1 = arith.extui %0 : i1 to i32
    %c0_i32_0 = arith.constant 0 : i32
    %2 = arith.cmpi ne, %1, %c0_i32_0 : i32
    scf.if %2 {
      %cst_24 = arith.constant 0.000000e+00 : f32
      %62 = vector.broadcast %cst_24 : f32 to vector<1x128xf32>
      %c0_25 = arith.constant 0 : index
      %c0_26 = arith.constant 0 : index
      %63 = vector.load %arg6[%c0_25, %c0_26] : memref<1x128xf32, #tpu.memory_space<vmem>>, vector<1x128xf32>
      tpu.vector_store %arg6[%c0_25, %c0_26], %62 {strides = array<i32>} : memref<1x128xf32, #tpu.memory_space<vmem>>, vector<1x128xf32>,
      %cst_27 = arith.constant 0.000000e+00 : f32
      %64 = vector.broadcast %cst_27 : f32 to vector<1x128xf32>
      %c0_28 = arith.constant 0 : index
      %c0_29 = arith.constant 0 : index
      %65 = vector.load %arg7[%c0_28, %c0_29] : memref<1x128xf32, #tpu.memory_space<vmem>>, vector<1x128xf32>
      tpu.vector_store %arg7[%c0_28, %c0_29], %64 {strides = array<i32>} : memref<1x128xf32, #tpu.memory_space<vmem>>, vector<1x128xf32>,
    } else {
    }
    %c0 = arith.constant 0 : index
    %c0_1 = arith.constant 0 : index
    %3 = vector.load %arg2[%c0, %c0_1] : memref<8x128xf32, #tpu.memory_space<vmem>>, vector<8x128xf32>
    %c0_2 = arith.constant 0 : index
    %c0_3 = arith.constant 0 : index
    %4 = vector.load %arg3[%c0_2, %c0_3] : memref<8x128xf32, #tpu.memory_space<vmem>>, vector<8x128xf32>
    %5 = math.absf %3 : vector<8x128xf32>
    %cst = arith.constant 0.000000e+00 : f32
    %6 = vector.broadcast %cst : f32 to vector<8x128xf32>
    %7 = arith.subf %6, %5 : vector<8x128xf32>
    %8 = math.exp %7 : vector<8x128xf32>
    %cst_4 = arith.constant 0.000000e+00 : f32
    %9 = vector.broadcast %cst_4 : f32 to vector<8x128xf32>
    %10 = arith.maximumf %3, %9 : vector<8x128xf32>
    %11 = arith.mulf %3, %4 : vector<8x128xf32>
    %12 = arith.subf %10, %11 : vector<8x128xf32>
    %13 = math.log1p %8 : vector<8x128xf32>
    %14 = arith.addf %12, %13 : vector<8x128xf32>
    %c1_i32 = arith.constant 1 : i32
    %15 = arith.muli %arg0, %c1_i32 : i32
    %16 = arith.addi %15, %arg1 : i32
    %c8_i32 = arith.constant 8 : i32
    %17 = arith.muli %16, %c8_i32 : i32
    %18 = tpu.iota {dimensions = array<i32: 0>} : vector<8x1xi32>
    %19 = vector.broadcast %17 : i32 to vector<8x1xi32>
    %20 = arith.addi %19, %18 : vector<8x1xi32>
    %c2_i32 = arith.constant 2 : i32
    %21 = vector.broadcast %c2_i32 : i32 to vector<8x1xi32>
    %22 = arith.cmpi slt, %20, %21 : vector<8x1xi32>
    %23 = tpu.iota {dimensions = array<i32: 1>} : vector<1x128xi32>
    %c64_i32 = arith.constant 64 : i32
    %24 = vector.broadcast %c64_i32 : i32 to vector<1x128xi32>
    %25 = arith.cmpi slt, %23, %24 : vector<1x128xi32>
    %c0_5 = arith.constant 0 : index
    %c0_6 = arith.constant 0 : index
    %26 = vector.load %arg6[%c0_5, %c0_6] : memref<1x128xf32, #tpu.memory_space<vmem>>, vector<1x128xf32>
    %27 = vector.broadcast %22 : vector<8x1xi1> to vector<8x128xi1>
    %28 = vector.broadcast %25 : vector<1x128xi1> to vector<8x128xi1>
    %29 = arith.andi %27, %28 : vector<8x128xi1>
    %cst_7 = arith.constant 0.000000e+00 : f32
    %30 = vector.broadcast %cst_7 : f32 to vector<8x128xf32>
    %31 = arith.select %29, %14, %30 : vector<8x128xi1>, vector<8x128xf32>
    %cst_8 = arith.constant dense<0.000000e+00> : vector<128xf32>
    %32 = vector.multi_reduction <add>, %31, %cst_8 [0] : vector<8x128xf32> to vector<128xf32>
    %33 = vector.shape_cast %32 : vector<128xf32> to vector<1x128xf32>
    %34 = arith.addf %26, %33 : vector<1x128xf32>
    %c0_9 = arith.constant 0 : index
    %c0_10 = arith.constant 0 : index
    %35 = vector.load %arg6[%c0_9, %c0_10] : memref<1x128xf32, #tpu.memory_space<vmem>>, vector<1x128xf32>
    tpu.vector_store %arg6[%c0_9, %c0_10], %34 {strides = array<i32>} : memref<1x128xf32, #tpu.memory_space<vmem>>, vector<1x128xf32>,
    %c0_11 = arith.constant 0 : index
    %c0_12 = arith.constant 0 : index
    %36 = vector.load %arg4[%c0_11, %c0_12] : memref<8x128xf32, #tpu.memory_space<vmem>>, vector<8x128xf32>
    %cst_13 = arith.constant 0.000000e+00 : f32
    %37 = vector.broadcast %cst_13 : f32 to vector<8x128xf32>
    %38 = arith.cmpf oge, %3, %37 : vector<8x128xf32>
    %cst_14 = arith.constant 1.000000e+00 : f32
    %39 = vector.broadcast %cst_14 : f32 to vector<8x128xf32>
    %40 = arith.select %38, %39, %8 : vector<8x128xi1>, vector<8x128xf32>
    %cst_15 = arith.constant 1.000000e+00 : f32
    %41 = vector.broadcast %cst_15 : f32 to vector<8x128xf32>
    %42 = arith.addf %41, %8 : vector<8x128xf32>
    %43 = arith.divf %40, %42 : vector<8x128xf32>
    %44 = arith.subf %43, %36 : vector<8x128xf32>
    %45 = tpu.iota {dimensions = array<i32: 1>} : vector<1x128xi32>
    %c32_i32 = arith.constant 32 : i32
    %46 = vector.broadcast %c32_i32 : i32 to vector<1x128xi32>
    %47 = arith.cmpi slt, %45, %46 : vector<1x128xi32>
    %c0_16 = arith.constant 0 : index
    %c0_17 = arith.constant 0 : index
    %48 = vector.load %arg7[%c0_16, %c0_17] : memref<1x128xf32, #tpu.memory_space<vmem>>, vector<1x128xf32>
    %49 = arith.mulf %44, %44 : vector<8x128xf32>
    %50 = vector.broadcast %22 : vector<8x1xi1> to vector<8x128xi1>
    %51 = vector.broadcast %47 : vector<1x128xi1> to vector<8x128xi1>
    %52 = arith.andi %50, %51 : vector<8x128xi1>
    %cst_18 = arith.constant 0.000000e+00 : f32
    %53 = vector.broadcast %cst_18 : f32 to vector<8x128xf32>
    %54 = arith.select %52, %49, %53 : vector<8x128xi1>, vector<8x128xf32>
    %cst_19 = arith.constant dense<0.000000e+00> : vector<128xf32>
    %55 = vector.multi_reduction <add>, %54, %cst_19 [0] : vector<8x128xf32> to vector<128xf32>
    %56 = vector.shape_cast %55 : vector<128xf32> to vector<1x128xf32>
    %57 = arith.addf %48, %56 : vector<1x128xf32>
    %c0_20 = arith.constant 0 : index
    %c0_21 = arith.constant 0 : index
    %58 = vector.load %arg7[%c0_20, %c0_21] : memref<1x128xf32, #tpu.memory_space<vmem>>, vector<1x128xf32>
    tpu.vector_store %arg7[%c0_20, %c0_21], %57 {strides = array<i32>} : memref<1x128xf32, #tpu.memory_space<vmem>>, vector<1x128xf32>,
    %c0_i32_22 = arith.constant 0 : i32
    %59 = arith.cmpi eq, %arg1, %c0_i32_22 : i32
    %60 = arith.extui %59 : i1 to i32
    %c0_i32_23 = arith.constant 0 : i32
    %61 = arith.cmpi ne, %60, %c0_i32_23 : i32
    scf.if %61 {
      %c0_24 = arith.constant 0 : index
      %c0_25 = arith.constant 0 : index
      %62 = vector.load %arg6[%c0_24, %c0_25] : memref<1x128xf32, #tpu.memory_space<vmem>>, vector<1x128xf32>
      %63 = vector.shape_cast %62 : vector<1x128xf32> to vector<1x1x128xf32>
      %cst_26 = arith.constant dense<0.000000e+00> : vector<1xf32>
      %64 = vector.multi_reduction <add>, %63, %cst_26 [1, 2] : vector<1x1x128xf32> to vector<1xf32>
      %65 = vector.shape_cast %64 : vector<1xf32> to vector<1x1x1xf32>
      %66 = vector.extract %65[0, 0, 0] : f32 from vector<1x1x1xf32>
      %cst_27 = arith.constant 7.812500e-03 : f32
      %67 = arith.mulf %66, %cst_27 : f32
      %c0_28 = arith.constant 0 : index
      %c0_29 = arith.constant 0 : index
      %68 = vector.load %arg7[%c0_28, %c0_29] : memref<1x128xf32, #tpu.memory_space<vmem>>, vector<1x128xf32>
      %69 = vector.shape_cast %68 : vector<1x128xf32> to vector<1x1x128xf32>
      %cst_30 = arith.constant dense<0.000000e+00> : vector<1xf32>
      %70 = vector.multi_reduction <add>, %69, %cst_30 [1, 2] : vector<1x1x128xf32> to vector<1xf32>
      %71 = vector.shape_cast %70 : vector<1xf32> to vector<1x1x1xf32>
      %72 = vector.extract %71[0, 0, 0] : f32 from vector<1x1x1xf32>
      %cst_31 = arith.constant 7.812500e-03 : f32
      %73 = arith.mulf %cst_31, %72 : f32
      %74 = arith.addf %67, %73 : f32
      %75 = vector.broadcast %74 : f32 to vector<1x8x128xf32>
      %c0_32 = arith.constant 0 : index
      %c0_33 = arith.constant 0 : index
      %c0_34 = arith.constant 0 : index
      %76 = vector.load %arg5[%c0_32, %c0_33, %c0_34] : memref<1x8x128xf32, #tpu.memory_space<vmem>>, vector<1x8x128xf32>
      tpu.vector_store %arg5[%c0_32, %c0_33, %c0_34], %75 {strides = array<i32>} : memref<1x8x128xf32, #tpu.memory_space<vmem>>, vector<1x8x128xf32>,
    } else {
    }
    return
  }
  func.func @transform_0(%arg0: i32, %arg1: i32) -> (i32, i32) {
    %c1_i32 = arith.constant 1 : i32
    %0 = arith.muli %arg0, %c1_i32 : i32
    %1 = arith.addi %0, %arg1 : i32
    %c0_i32 = arith.constant 0 : i32
    %2 = arith.minsi %1, %c0_i32 : i32
    %c0_i32_0 = arith.constant 0 : i32
    %c0_i32_1 = arith.constant 0 : i32
    return %2, %c0_i32_0 : i32, i32
  }
  func.func @transform_1(%arg0: i32, %arg1: i32) -> (i32, i32) {
    %c1_i32 = arith.constant 1 : i32
    %0 = arith.muli %arg0, %c1_i32 : i32
    %1 = arith.addi %0, %arg1 : i32
    %c0_i32 = arith.constant 0 : i32
    %2 = arith.minsi %1, %c0_i32 : i32
    %c0_i32_0 = arith.constant 0 : i32
    %c0_i32_1 = arith.constant 0 : i32
    return %2, %c0_i32_0 : i32, i32
  }
  func.func @transform_2(%arg0: i32, %arg1: i32) -> (i32, i32) {
    %c1_i32 = arith.constant 1 : i32
    %0 = arith.muli %arg0, %c1_i32 : i32
    %1 = arith.addi %0, %arg1 : i32
    %c0_i32 = arith.constant 0 : i32
    %2 = arith.minsi %1, %c0_i32 : i32
    %c0_i32_0 = arith.constant 0 : i32
    %c0_i32_1 = arith.constant 0 : i32
    return %2, %c0_i32_0 : i32, i32
  }
  func.func @transform_3(%arg0: i32, %arg1: i32) -> (i32, i32, i32) {
    %c0_i32 = arith.constant 0 : i32
    %c0_i32_0 = arith.constant 0 : i32
    %c0_i32_1 = arith.constant 0 : i32
    return %arg0, %c0_i32, %c0_i32_0 : i32, i32, i32
  }
}

</mosaic_0001>

<bundles_post_ra>
// kernel: tpu_custom_call.1
= control target key start
LH: loop header
LB: loop body
LE: loop exit
PB: predicated region body
PF: predicated region fallthrough
CT: control target
= control target key end

     0   :  { %8 = vsyncpa [#allocation5], 0  ;;  %s413_s0 = inlined_call_operand.hbm [shape: f32[2,64], index: 0, kind: input, shape index: {}]   ;;  %s414_s1 = inlined_call_operand.hbm [shape: f32[2,64], index: 1, kind: input, shape index: {}]   ;;  %s415_s2 = inlined_call_operand.hbm [shape: f32[2,32], index: 2, kind: input, shape index: {}]   ;;  %s416_s3 = inlined_call_operand.hbm [shape: f32[1,8,128], index: 3, kind: output, shape index: {}]  }
   0x1   :  { %9 = vsyncpa [#allocation8], 0 }
   0x2   :  { %10 = vsyncpa [#allocation6], 0 }
   0x3   :  { %21 = vsyncadd [#allocation5], 96  ;;  %s26_s14 = sshll.u32 %s413_s0, 4  ;;  %s372_s15 = smov [#allocation4]   ;;  %s27_s14 = int_to_ptr.hbm [resolvable:$true] %s26_s14 }
   0x4   :  { %s28_s16 = sshll.u32 %s372_s15, 4  ;;  %s373_s17 = smov 32   ;;  %s29_s16 = int_to_ptr.vmem [resolvable:$true] %s28_s16 }
   0x5   :  { %s374_s18 = smov 2  }
   0x6   :  { %34 = dma.hbm_to_vmem [thread:$0]  %s27_s14, 32, %s29_s16, [#allocation5], %s373_s17, %s373_s17, %s374_s18  }
   0x7   :  { %45 = vsyncadd [#allocation8], 96  ;;  %s50_s21 = sshll.u32 %s414_s1, 4  ;;  %s375_s22 = smov [#allocation7]   ;;  %s51_s21 = int_to_ptr.hbm [resolvable:$true] %s50_s21 }
   0x8   :  { %s52_s23 = sshll.u32 %s375_s22, 4  ;;  %s53_s23 = int_to_ptr.vmem [resolvable:$true] %s52_s23 }
   0x9   :  { %58 = dma.hbm_to_vmem [thread:$0]  %s51_s21, 32, %s53_s23, [#allocation8], %s373_s17, %s373_s17, %s374_s18  }
   0xa   :  { %69 = vsyncadd [#allocation8], 96  ;;  %s74_s25 = sshll.u32 %s415_s2, 4  ;;  %s376_s26 = smov [#allocation9]   ;;  %s75_s25 = int_to_ptr.hbm [resolvable:$true] %s74_s25 }
   0xb   :  { %s76_s27 = sshll.u32 %s376_s26, 4  ;;  %s77_s27 = int_to_ptr.vmem [resolvable:$true] %s76_s27 }
   0xc   :  { %82 = dma.hbm_to_vmem [thread:$0]  %s75_s25, 32, %s77_s27, [#allocation8], %s373_s17, %s373_s17, %s374_s18  }
   0xd   :  { %366 = dma.done.wait [#allocation5], 128  }
   0xe   :  { %367 = vsyncadd [#allocation5], 4294967168 }
   0xf   :  { %368 = dma.done.wait [#allocation8], 256  }
  0x10   :  { %369 = vsyncadd [#allocation8], 4294967040  ;;  %v377_v0 = vmov 0.0   ;;  %v119_v1 = vld [vmem:[#allocation4] sm:$0xff]  ;;  %v140_v6 = vlaneseq  ;;  %v120_v9 = vld [vmem:[#allocation7] sm:$0xff]  ;;  %vm202_vm11 = vcmask 1040384  }
  0x11   :  { %117 = vst [vmem:[#allocation2] sm:$0x1] %v377_v0  ;;  %v121_v2 = vand.u32 2147483647, %v119_v1  ;;  %v125_v12 = vmax.f32 %v119_v1, 0.0  ;;  %v126_v13 = vmul.f32 %v120_v9, %v119_v1  ;;  %vm164_vm6 = vcmp.ge.f32.partialorder %v119_v1, 0.0 }
  0x12   :  { %118 = vst [vmem:[#allocation3] sm:$0x1] %v377_v0  ;;  %v141_v11 = vshrl.u32 %v140_v6, 7  ;;  %v146_v15 = vand.u32 127, %v140_v6  ;;  %v163_v36 = vld [vmem:[#allocation9] sm:$0xff]  ;;  %s378_s2 = smov [#allocation10]  }
  0x13   :  { %v122_v3 = vsub.f32 0.0, %v121_v2  ;;  %v127_v18 = vsub.f32 %v125_v12, %v126_v13  ;;  %s234_s28 = sshll.u32 %s378_s2, 4  ;;  %s236_s7 = sshll.u32 %s416_s3, 4  ;;  %s235_s28 = int_to_ptr.vmem [resolvable:$true] %s234_s28  ;;  %s237_s7 = int_to_ptr.hbm [resolvable:$true] %s236_s7 }
  0x14   :  { %vm144_vm1 = vcmp.lt.s32.totalorder %v141_v11, 2  ;;  %vm147_vm2 = vcmp.lt.s32.totalorder %v146_v15, 64  ;;  %vm183_vm9 = vcmp.lt.s32.totalorder %v146_v15, 32 }
  0x15   :  { %v123_v4 = vmul.f32 1.442695, %v122_v3  ;;  %vm153_vm3 = vmand %vm144_vm1, %vm147_vm2 }
  0x16   :  { %vm188_vm10 = vmand %vm144_vm1, %vm183_vm9 }
  0x17   :  { %264 = vpow2.f32 %v123_v4 }
  0x18   :  { %v148_v42 = vld [vmem:[#allocation2] sm:$0x1] }
  0x19   :  { %v184_v53 = vld [vmem:[#allocation3] sm:$0x1] }
  0x1d   :  { %v265_v5 = vpop.eup %264 }
  0x1e   :  { %v128_v7 = vadd.f32 1.0, %v265_v5  ;;  %v131_v8 = vmul.f32 -0.5, %v265_v5  ;;  %v134_v14 = vand.u32 2147483647, %v265_v5  ;;  %v165_v33 = vsel %vm164_vm6, 1.0, %v265_v5 }
  0x20   :  { %266 = vlog2.f32 %v128_v7  ;;  %v132_v10 = vadd.f32 1.0, %v131_v8  ;;  %vm135_vm0 = vcmp.lt.f32.partialorder %v134_v14, 0.0004427343  ;;  %vm172_vm4 = vweird.f32 %v128_v7 }
  0x21   :  { %268 = vrcp.f32 %v128_v7  ;;  %v178_v23 = vand.u32 2147483648, %v128_v7  ;;  %v176_v26 = vand.u32 2147483647, %v128_v7 }
  0x22   :  { %v133_v16 = vmul.f32 %v265_v5, %v132_v10 }
  0x23   :  { %v179_v30 = vor.u32 1.1754944e-38, %v178_v23  ;;  %vm177_vm8 = vcmp.eq.f32.partialorder %v176_v26, 8.507059e+37 }
  0x26   :  { %v267_v17 = vpop.eup %266 }
  0x27   :  { %v269_v19 = vpop.eup %268  ;;  %v130_v20 = vmul.f32 0.6931472, %v267_v17 }
  0x28   :  { %v168_v21 = vmul.f32 %v269_v19, %v128_v7  ;;  %vm173_vm5 = vweird.f32 %v269_v19 }
  0x29   :  { %v136_v22 = vsel %vm135_vm0, %v133_v16, %v130_v20  ;;  %vm174_vm7 = vmor %vm172_vm4, %vm173_vm5 }
  0x2a   :  { %v137_v24 = vadd.f32 %v136_v22, %v127_v18  ;;  %v169_v25 = vsub.f32 1.0, %v168_v21 }
  0x2c   :  { %v154_v27 = vsel %vm153_vm3, %v137_v24, 0.0  ;;  %v170_v28 = vmul.f32 %v269_v19, %v169_v25 }
  0x2d   :  { %v155_v29 = vrot.slane %v154_v27, 4 }
  0x2e   :  { %v171_v31 = vadd.f32 %v269_v19, %v170_v28 }
  0x2f   :  { %v156_v32 = vadd.f32 %v155_v29, %v154_v27 }
  0x30   :  { %v175_v34 = vsel %vm174_vm7, %v269_v19, %v171_v31 }
  0x31   :  { %v157_v35 = vrot.slane %v156_v32, 2  ;;  %v180_v37 = vsel %vm177_vm8, %v179_v30, %v175_v34 }
  0x32   :  { %v181_v38 = vmul.f32 %v180_v37, %v165_v33 }
  0x33   :  { %v158_v39 = vadd.f32 %v157_v35, %v156_v32 }
  0x34   :  { %v182_v40 = vsub.f32 %v181_v38, %v163_v36 }
  0x35   :  { %v159_v41 = vrot.slane %v158_v39, 1 }
  0x36   :  { %v185_v43 = vmul.f32 %v182_v40, %v182_v40 }
  0x37   :  { %v160_v44 = vadd.f32 %v159_v41, %v158_v39 }
  0x38   :  { %v189_v45 = vsel %vm188_vm10, %v185_v43, 0.0 }
  0x39   :  { %v161_v46 = vadd.f32 %v160_v44, %v148_v42  ;;  %v190_v47 = vrot.slane %v189_v45, 4 }
  0x3b   :  { %162 = vst [vmem:[#allocation2] sm:$0x1] %v161_v46  ;;  %v191_v48 = vadd.f32 %v190_v47, %v189_v45 }
  0x3d   :  { %v192_v49 = vrot.slane %v191_v48, 2 }
  0x3f   :  { %v193_v50 = vadd.f32 %v192_v49, %v191_v48 }
  0x41   :  { %v194_v51 = vrot.slane %v193_v50, 1 }
  0x42   :  { %v201_v52 = vld [vmem:[#allocation2] sm:$0x1] }
  0x43   :  { %v203_v54 = vsel %vm202_vm11, %v201_v52, 0.0  ;;  %v195_v55 = vadd.f32 %v194_v51, %v193_v50 }
  0x44   :  { %204 = vadd.xlane.f32.xlu0 %v203_v54 }
  0x45   :  { %v196_v56 = vadd.f32 %v195_v55, %v184_v53 }
  0x47   :  { %197 = vst [vmem:[#allocation3] sm:$0x1] %v196_v56 }
  0x4e   :  { %v214_v57 = vld [vmem:[#allocation3] sm:$0x1] }
  0x4f   :  { %v215_v58 = vsel %vm202_vm11, %v214_v57, 0.0 }
  0x50   :  { %216 = vadd.xlane.f32.xlu0 %v215_v58 }
  0xb7   :  { %v205_v59 = vpop.xlane.xlu0 %204 }
  0xb8   :  { %v206_v60 = vrot.slane %v205_v59, 4 }
  0xba   :  { %v207_v61 = vadd.f32 %v206_v60, %v205_v59 }
  0xbc   :  { %v208_v62 = vrot.slane %v207_v61, 2 }
  0xbe   :  { %v209_v63 = vadd.f32 %v208_v62, %v207_v61 }
  0xc0   :  { %v210_v0 = vrot.slane %v209_v63, 1 }
  0xc2   :  { %v211_v1 = vadd.f32 %v210_v0, %v209_v63 }
  0xc3   :  { %v217_v2 = vpop.xlane.xlu0 %216 }
  0xc4   :  { %v218_v3 = vrot.slane %v217_v2, 4  ;;  %253 = vpush %v211_v1 }
  0xc6   :  { %v219_v4 = vadd.f32 %v218_v3, %v217_v2 }
  0xc8   :  { %v220_v5 = vrot.slane %v219_v4, 2 }
  0xca   :  { %v221_v6 = vadd.f32 %v220_v5, %v219_v4 }
  0xcc   :  { %v222_v7 = vrot.slane %v221_v6, 1 }
  0xce   :  { %v223_v8 = vadd.f32 %v222_v7, %v221_v6 }
  0xd0   :  { %255 = vpush %v223_v8 }
  0xf5   :  { %s254_s1 = spop %253 }
  0xf6   :  { %s213_s29 = smul.f32 0.0078125, %s254_s1 }
 0x101   :  { %s256_s30 = spop %255 }
 0x102   :  { %s225_s4 = smul.f32 0.0078125, %s256_s30 }
 0x104   :  { %s226_s8 = sadd.f32 %s225_s4, %s213_s29 }
 0x106   :  { %v227_v9 = vstv %s226_s8 }
 0x107   :  { %228 = vst [vmem:[#allocation10] sm:$0xff] %v227_v9 }
 0x108   :  { %239 = dma.vmem_to_hbm [thread:$0]  %s235_s28, 128, %s237_s7, [#allocation6]  }
 0x109   :  { %370 = dma.done.wait [#allocation6], 128  }
 0x10a   :  { %371 = vsyncadd [#allocation6], 4294967168 }
 0x10b   :  { %244 = vsyncpa [#allocation5], 1 }
 0x10c   :  { %245 = vsyncpa [#allocation8], 1 }
 0x10d   :  { %246 = vsyncpa [#allocation6], 1 }

</bundles_post_ra>
